<compile_context>
chip_gen: v7x
topology: tpu7x:2x2x1
jax: 0.10.0
libtpu: 0.0.40
codegen_flags: <defaults>
</compile_context>

<pallas_src>
import functools

import jax
import jax.numpy as jnp
from jax.experimental import pallas as pl
from jax.experimental.pallas import tpu as pltpu


def _round_up(x, m):
    return pl.cdiv(x, m) * m


# ---------------------------------------------------------------------------
# Kernel 1: BCE scoring against all entities  (forward_bce / get_score)
# ---------------------------------------------------------------------------
def _distmult_bce_kernel(e1_ref, r_ref, entT_ref, out_ref, *, compute_dtype):
    # inp_drop == identity in eval mode.
    x = e1_ref[...] * r_ref[...]                               # (tb, D)  VPU, f32
    scores = jnp.dot(x.astype(compute_dtype), entT_ref[...],   # (tb, tn) one MXU pass
                     preferred_element_type=jnp.float32)
    out_ref[...] = jax.nn.sigmoid(scores).astype(out_ref.dtype)


def distmult_bce_forward(e1_ids, rel_ids, ent_emb, rel_emb, *,
                         entT=None, tb=128, tn=2048,
                         compute_dtype=jnp.bfloat16):
    """pred[b, e] = sigmoid(sum_d E[e1_b, d] * R[rel_b, d] * E[e, d])."""
    B = e1_ids.shape[0]
    num_ent, dim = ent_emb.shape

    # Glue (plain JAX): embedding gathers + entity-table transpose.  In
    # production entT should be computed/cached once outside the per-batch
    # path; it is accepted as an argument here for exactly that reason.
    e1 = ent_emb[e1_ids].astype(jnp.float32)                   # (B, D)
    r = rel_emb[rel_ids].astype(jnp.float32)                   # (B, D)
    if entT is None:
        entT = ent_emb.T
    entT = entT.astype(compute_dtype)                          # (D, num_ent)
    # TODO(synk): the e1/r gathers could be fused into the kernel via
    # PrefetchScalarGridSpec(num_scalar_prefetch=1) + pl.Element row maps.

    # Batch tile (sublane-aligned, up to 128) and lane-dense entity tile.
    tb = min(tb, _round_up(B, 8))
    tn = min(tn, _round_up(num_ent, 128))
    Bp = _round_up(B, tb)
    Np = _round_up(num_ent, tn)

    e1 = jnp.pad(e1, ((0, Bp - B), (0, 0)))
    r = jnp.pad(r, ((0, Bp - B), (0, 0)))
    entT = jnp.pad(entT, ((0, 0), (0, Np - num_ent)))

    kernel = functools.partial(_distmult_bce_kernel, compute_dtype=compute_dtype)
    out = pl.pallas_call(
        kernel,
        out_shape=jax.ShapeDtypeStruct((Bp, Np), jnp.float32),
        grid_spec=pltpu.PrefetchScalarGridSpec(
            num_scalar_prefetch=0,
            grid=(Bp // tb, Np // tn),
            in_specs=[
                pl.BlockSpec((tb, dim), lambda i, j: (i, 0)),   # e1  (resident over j)
                pl.BlockSpec((tb, dim), lambda i, j: (i, 0)),   # r   (resident over j)
                pl.BlockSpec((dim, tn), lambda i, j: (0, j)),   # E^T (pipelined over j)
            ],
            out_specs=pl.BlockSpec((tb, tn), lambda i, j: (i, j)),
        ),
        compiler_params=pltpu.CompilerParams(
            dimension_semantics=("parallel", "parallel")),
    )(e1, r, entT)
    return out[:B, :num_ent]


# ---------------------------------------------------------------------------
# Kernel 2: triple scoring  (forward / forward2 / _calc)
# ---------------------------------------------------------------------------
def _distmult_triple_kernel(eh_ref, er_ref, et_ref, out_ref):
    prod = eh_ref[...] * er_ref[...] * et_ref[...]             # (tb, D)  VPU
    out_ref[...] = jnp.sum(prod, axis=-1, keepdims=True)       # (tb, 1)  XLU reduce


def distmult_triple_forward(h_ids, r_ids, t_ids, ent_emb, rel_emb, *, tb=128):
    """score[b] = sum_d E[h_b, d] * R[r_b, d] * E[t_b, d]."""
    B = h_ids.shape[0]
    dim = ent_emb.shape[1]
    eh = ent_emb[h_ids].astype(jnp.float32)
    er = rel_emb[r_ids].astype(jnp.float32)
    et = ent_emb[t_ids].astype(jnp.float32)

    tb = min(tb, _round_up(B, 8))
    Bp = _round_up(B, tb)
    eh = jnp.pad(eh, ((0, Bp - B), (0, 0)))
    er = jnp.pad(er, ((0, Bp - B), (0, 0)))
    et = jnp.pad(et, ((0, Bp - B), (0, 0)))

    out = pl.pallas_call(
        _distmult_triple_kernel,
        out_shape=jax.ShapeDtypeStruct((Bp, 1), jnp.float32),
        grid_spec=pltpu.PrefetchScalarGridSpec(
            num_scalar_prefetch=0,
            grid=(Bp // tb,),
            in_specs=[
                pl.BlockSpec((tb, dim), lambda i: (i, 0)),
                pl.BlockSpec((tb, dim), lambda i: (i, 0)),
                pl.BlockSpec((tb, dim), lambda i: (i, 0)),
            ],
            out_specs=pl.BlockSpec((tb, 1), lambda i: (i, 0)),
        ),
        compiler_params=pltpu.CompilerParams(
            dimension_semantics=("parallel",)),
    )(eh, er, et)
    return out[:B, 0]


# ---------------------------------------------------------------------------
# Pure-JAX references (PyTorch eval-mode semantics)
# ---------------------------------------------------------------------------
def ref_bce(e1_ids, rel_ids, ent_emb, rel_emb):
    x = ent_emb[e1_ids] * rel_emb[rel_ids]
    scores = jnp.dot(x, ent_emb.T, precision=jax.lax.Precision.HIGHEST)
    return jax.nn.sigmoid(scores)


def ref_triple(h_ids, r_ids, t_ids, ent_emb, rel_emb):
    return jnp.sum(ent_emb[h_ids] * rel_emb[r_ids] * ent_emb[t_ids], axis=-1)


if __name__ == "__main__":
    num_ent = 256
    num_rel = 8               # bce loss -> module uses num_rel * 2 relation rows
    emb_dim = 32
    batch = 16

    key = jax.random.PRNGKey(0)
    k_e, k_r, k_h, k_rel, k_t = jax.random.split(key, 5)

    # xavier_uniform_: U(-a, a), a = sqrt(6 / (fan_in + fan_out))
    a_ent = (6.0 / (num_ent + emb_dim)) ** 0.5
    a_rel = (6.0 / (2 * num_rel + emb_dim)) ** 0.5
    ent_emb = jax.random.uniform(k_e, (num_ent, emb_dim), jnp.float32, -a_ent, a_ent)
    rel_emb = jax.random.uniform(k_r, (2 * num_rel, emb_dim), jnp.float32,
                                 -a_rel, a_rel)

    hs = jax.random.randint(k_h, (batch,), 0, num_ent, jnp.int32)
    rs = jax.random.randint(k_rel, (batch,), 0, 2 * num_rel, jnp.int32)
    ts = jax.random.randint(k_t, (batch,), 0, num_ent, jnp.int32)

    # Cached E^T (hoisted out of the per-batch path).
    entT = ent_emb.T

    # --- forward_bce path: exact f32 matmul and fast bf16 matmul -------------
    want = ref_bce(hs, rs, ent_emb, rel_emb)

    pred_f32 = distmult_bce_forward(hs, rs, ent_emb, rel_emb, entT=entT,
                                    tb=128, tn=128,
                                    compute_dtype=jnp.float32)
    pred_f32 = jax.block_until_ready(pred_f32)
    assert pred_f32.shape == (batch, num_ent)
    assert jnp.allclose(pred_f32, want, atol=1e-4, rtol=1e-4), (
        float(jnp.max(jnp.abs(pred_f32 - want))))

    pred_bf16 = distmult_bce_forward(hs, rs, ent_emb, rel_emb, entT=entT,
                                     tb=128, tn=128,
                                     compute_dtype=jnp.bfloat16)
    pred_bf16 = jax.block_until_ready(pred_bf16)
    assert jnp.allclose(pred_bf16, want, atol=5e-3, rtol=5e-3), (
        float(jnp.max(jnp.abs(pred_bf16 - want))))

    # --- forward / _calc path (triple scoring) --------------------------------
    score = distmult_triple_forward(hs, rs, ts, ent_emb, rel_emb)
    score = jax.block_until_ready(score)
    want_s = ref_triple(hs, rs, ts, ent_emb, rel_emb)
    assert score.shape == (batch,)
    assert jnp.allclose(score, want_s, atol=1e-5, rtol=1e-5), (
        float(jnp.max(jnp.abs(score - want_s))))

    print("KERNEL_OK")
</pallas_src>

<mosaic_0001>
module attributes {stable_mosaic.version = 11 : i64} {
  func.func @_distmult_bce_kernel(%arg0: i32, %arg1: i32, %arg2: memref<16x32xf32, #tpu.memory_space<vmem>>, %arg3: memref<16x32xf32, #tpu.memory_space<vmem>>, %arg4: memref<32x128xf32, #tpu.memory_space<vmem>>, %arg5: memref<16x128xf32, #tpu.memory_space<vmem>>) attributes {dimension_semantics = [#tpu.dimension_semantics<parallel>, #tpu.dimension_semantics<parallel>], iteration_bounds = array<i64: 1, 2>, scalar_prefetch = 0 : i64, scratch_operands = 0 : i64, tpu.core_type = #tpu.core_type<tc>, window_params = [{transform_indices = @transform_0, window_bounds = array<i64: 16, 32>}, {transform_indices = @transform_1, window_bounds = array<i64: 16, 32>}, {transform_indices = @transform_2, window_bounds = array<i64: 32, 128>}, {transform_indices = @transform_3, window_bounds = array<i64: 16, 128>}]} {
    %c0 = arith.constant 0 : index
    %c0_0 = arith.constant 0 : index
    %0 = vector.load %arg2[%c0, %c0_0] : memref<16x32xf32, #tpu.memory_space<vmem>>, vector<16x32xf32>
    %c0_1 = arith.constant 0 : index
    %c0_2 = arith.constant 0 : index
    %1 = vector.load %arg3[%c0_1, %c0_2] : memref<16x32xf32, #tpu.memory_space<vmem>>, vector<16x32xf32>
    %2 = arith.mulf %0, %1 : vector<16x32xf32>
    %c0_3 = arith.constant 0 : index
    %c0_4 = arith.constant 0 : index
    %3 = vector.load %arg4[%c0_3, %c0_4] : memref<32x128xf32, #tpu.memory_space<vmem>>, vector<32x128xf32>
    %cst = arith.constant dense<0.000000e+00> : vector<16x128xf32>
    %4 = tpu.matmul %2, %3, %cst {dimension_numbers = #tpu.dot_dimension_numbers<[1], [0], [0], [1], [0, 0, 1, 1], [], []>} : vector<16x32xf32>, vector<32x128xf32>, vector<16x128xf32> -> vector<16x128xf32>
    %5 = arith.negf %4 : vector<16x128xf32>
    %6 = math.exp %5 : vector<16x128xf32>
    %cst_5 = arith.constant 1.000000e+00 : f32
    %7 = vector.broadcast %cst_5 : f32 to vector<16x128xf32>
    %8 = arith.addf %7, %6 : vector<16x128xf32>
    %9 = arith.divf %7, %8 : vector<16x128xf32>
    %c0_6 = arith.constant 0 : index
    %c0_7 = arith.constant 0 : index
    %10 = vector.load %arg5[%c0_6, %c0_7] : memref<16x128xf32, #tpu.memory_space<vmem>>, vector<16x128xf32>
    tpu.vector_store %arg5[%c0_6, %c0_7], %9 {strides = array<i32>} : memref<16x128xf32, #tpu.memory_space<vmem>>, vector<16x128xf32>,
    return
  }
  func.func @transform_0(%arg0: i32, %arg1: i32) -> (i32, i32) {
    %c0_i32 = arith.constant 0 : i32
    %c0_i32_0 = arith.constant 0 : i32
    return %arg0, %c0_i32 : i32, i32
  }
  func.func @transform_1(%arg0: i32, %arg1: i32) -> (i32, i32) {
    %c0_i32 = arith.constant 0 : i32
    %c0_i32_0 = arith.constant 0 : i32
    return %arg0, %c0_i32 : i32, i32
  }
  func.func @transform_2(%arg0: i32, %arg1: i32) -> (i32, i32) {
    %c0_i32 = arith.constant 0 : i32
    %c0_i32_0 = arith.constant 0 : i32
    return %c0_i32, %arg1 : i32, i32
  }
  func.func @transform_3(%arg0: i32, %arg1: i32) -> (i32, i32) {
    %c0_i32 = arith.constant 0 : i32
    return %arg0, %arg1 : i32, i32
  }
}

</mosaic_0001>

<bundles_post_ra>
// kernel: tpu_custom_call.1
= control target key start
LH: loop header
LB: loop body
LE: loop exit
PB: predicated region body
PF: predicated region fallthrough
CT: control target
= control target key end

     0   :  { %8 = vsyncpa [#allocation3], 0  ;;  %s1096_s0 = inlined_call_operand.hbm [shape: f32[16,32], index: 0, kind: input, shape index: {}]   ;;  %s1097_s1 = inlined_call_operand.hbm [shape: f32[16,32], index: 1, kind: input, shape index: {}]   ;;  %s1098_s2 = inlined_call_operand.hbm [shape: f32[32,256], index: 2, kind: input, shape index: {}]   ;;  %s1099_s3 = inlined_call_operand.hbm [shape: f32[16,256], index: 3, kind: output, shape index: {}]  }
   0x1   :  { %9 = vsyncpa [#allocation6], 0 }
   0x2   :  { %10 = vsyncpa [#allocation4], 0 }
   0x3   :  { %12 = vsyncpa [#allocation4 + $0x1], 0  ;;  %s827_s12 = smov 0   ;;  %s829_s13 = smov 0  }
   0x4   :  { %s831_s14 = smov 0   ;;  %s833_s15 = smov 0  }
   0x5   :  { %s835_s16 = smov 0   ;;  %s837_s17 = smov 0  }
   0x6 LB: > { %s858_s18 = sadd.s32 4294967295, %s795_s17   ;;  %s477_s19 = sadd.s32 4294967294, %s795_s17   ;;  %s795_s17 = sphi %s837_s17, %s18_s17   ;;  %s791_s16 = sphi %s835_s16, %s1124_s16   ;;  %s787_s15 = sphi %s833_s15, %s1123_s15   ;;  %s783_s14 = sphi %s831_s14, %s1122_s14   ;;  %s779_s13 = sphi %s829_s13, %s1121_s13   ;;  %s775_s12 = sphi %s827_s12, %s1120_s12  }
   0x7   : > { %s89_s20 = sadd.s32 1, %s783_s14  ;;  %p96_p0 = scmp.ne.s32.totalorder %s783_s14, %s779_s13 }
   0x8   : > { %p97_p1 = scmp.eq.s32.totalorder %s795_s17, 0  ;;  %p102_p2 = scmp.ne.s32.totalorder %s779_s13, %s775_s12 }
   0x9   : > { %p1100_p3 = scmp.eq.s32.totalorder %s858_s18, 0  ;;  %p128_p4 = scmp.eq.s32.totalorder %s858_s18, 1 }
   0xa   : > { %p869_p5 = por %p97_p1, %p96_p0  ;;  %p134_p6 = scmp.eq.s32.totalorder %s477_s19, 1 }
   0xb   : > { %p875_p7 = por %p1100_p3, %p102_p2  ;;  %p879_p8 = por %p128_p4, %p96_p0 }
   0xc   : > { %p883_p9 = por %p134_p6, %p102_p2  ;;  %p478_p10 = scmp.ge.s32.totalorder %s795_s17, 1 }
   0xd   : > { %s1105_s22 = scalar_select %p875_p7, 1, 0 }
   0xe   : > { %s1106_s23 = scalar_select %p879_p8, 1, 0 }
   0xf   : > { %s1107_s24 = scalar_select %p883_p9, 1, 0 }
  0x10   : > { %p141_p11 = scmp.lt.s32.totalorder %s795_s17, 3  ;;  %s797_s26 = smov [#allocation2]  }
  0x11   : > { %s156_s27 = sshll.u32 %s797_s26, 4  ;;  %p551_p1 = scmp.lt.s32.totalorder %s795_s17, 2  ;;  %s893_s27 = int_to_ptr.vmem [resolvable:$true] %s156_s27 }
  0x12   : > { %p889_p12 = pnand %p478_p10, %p141_p11  ;;  %s798_s29 = smov [#allocation5]  }
  0x13   : > { %s172_s30 = sshll.u32 %s798_s29, 4  ;;  %p907_p4 = pnand %p551_p1, %p869_p5  ;;  %s911_s30 = int_to_ptr.vmem [resolvable:$true] %s172_s30 }
  0x14   : > { %p534_p13 = pneg %p889_p12  ;;  %s619_s7 = scalar_lea.hbm %s1096_s0, 256 }
  0x15   : > { %p620_p6 = scmp.ne.s32.totalorder %s1096_s0, %s619_s7  ;;  %p626_p5 = scmp.lt.u32.totalorder %s619_s7, %s1096_s0 }
  0x16   : > { %p901_p2 = pnand %p534_p13, %p1100_p3 }
  0x18   : > { %p621_p10 = pneg %p901_p2 }
  0x1a   : > { %p622_p11 = pnand %p621_p10, %p620_p6 }
  0x1c   : > { %p623_p13 = pneg %p622_p11 }
  0x1e   : > { %p628_p1 = pnand %p626_p5, %p623_p13 }
  0x20   : > { %631 = shalt.err (!%p628_p1)
}
  0x21   : > { %s632_s19 = scalar_lea.vmem %s893_s27, 256  ;;  %p640_p8 = scmp.lt.s32.totalorder %s893_s27, %s893_s27 }
  0x22   : > { %p633_p0 = scmp.ne.s32.totalorder %s893_s27, %s632_s19  ;;  %p641_p6 = scmp.lt.s32.totalorder %s632_s19, %s632_s19 }
  0x24   : > { %p635_p3 = pnand %p633_p0, %p621_p10  ;;  %p642_p11 = por %p641_p6, %p640_p8 }
  0x26   : > { %p636_p9 = pneg %p635_p3 }
  0x28   : > { %p643_p7 = pnand %p642_p11, %p636_p9 }
  0x2a   : > { %646 = shalt.err (!%p643_p7)
}
  0x2b   : > { %s1103_s21 = smov 128   ;;  %s800_s26 = smov 8  }
  0x2c   : > { %537 = dma.hbm_to_vmem [thread:$0]  (!%p901_p2), %s1096_s0, 256, %s893_s27, [#allocation3], %s1103_s21, %s1103_s21, %s800_s26  }
  0x2d   : > { %s647_s8 = scalar_lea.hbm %s1097_s1, 256 }
  0x2e   : > { %p648_p3 = scmp.ne.s32.totalorder %s1097_s1, %s647_s8  ;;  %p654_p9 = scmp.lt.u32.totalorder %s647_s8, %s1097_s1 }
  0x30   : > { %p650_p7 = pnand %p648_p3, %p621_p10 }
  0x32   : > { %p651_p8 = pneg %p650_p7 }
  0x34   : > { %p656_p0 = pnand %p654_p9, %p651_p8 }
  0x36   : > { %659 = shalt.err (!%p656_p0)
}
  0x37   : > { %s660_s27 = scalar_lea.vmem %s911_s30, 256  ;;  %p668_p6 = scmp.lt.s32.totalorder %s911_s30, %s911_s30 }
  0x38   : > { %p661_p13 = scmp.ne.s32.totalorder %s911_s30, %s660_s27  ;;  %p669_p11 = scmp.lt.s32.totalorder %s660_s27, %s660_s27 }
  0x3a   : > { %p663_p5 = pnand %p661_p13, %p621_p10  ;;  %p670_p3 = por %p669_p11, %p668_p6 }
  0x3c   : > { %p664_p1 = pneg %p663_p5 }
  0x3e   : > { %p671_p7 = pnand %p670_p3, %p664_p1 }
  0x40   : > { %674 = shalt.err (!%p671_p7)
}
  0x41   : > { %540 = dma.hbm_to_vmem [thread:$0]  (!%p901_p2), %s1097_s1, 256, %s911_s30, [#allocation6], %s1103_s21, %s1103_s21, %s800_s26  }
  0x42   : > { %s27_s6 = sadd.s32 1, %s791_s16  ;;  %s186_s7 = sand.u32 1, %s795_s17  }
  0x43   : > { %p28_p10 = scmp.ge.s32.totalorder %s27_s6, 2  ;;  %s188_s28 = sand.u32 1, %s783_s14  }
  0x44   : > { %s483_s8 = sshll.u32 %s791_s16, 7  ;;  %s482_s9 = sshll.u32 %s188_s28, 5 }
  0x45   : > { %s1126_s6 = smov (%p28_p10, %s27_s6), 0  ;;  %s980_s19 = scalar_lea.hbm %s1098_s2, %s483_s8 }
  0x46   : > { %s86_s30 = ssub.s32 %s791_s16, %s1126_s6  ;;  %s190_s27 = scalar_lea.vmem [#allocation7], %s482_s9 }
  0x47   : > { %p87_p2 = scmp.eq.s32.totalorder %s86_s30, 0  ;;  %s196_s29 = sshll.u32 %s190_s27, 4  ;;  %s984_s29 = int_to_ptr.vmem [resolvable:$true] %s196_s29 }
  0x48   : > { %s991_s21 = scalar_lea.sflag [#allocation3], %s186_s7  ;;  %s675_s28 = scalar_lea.hbm %s980_s19, 512 }
  0x49   : > { %s989_s5 = scalar_select %p87_p2, %s783_s14, %s89_s20  }
  0x4a   : > { %p676_p8 = scmp.ne.s32.totalorder %s980_s19, %s675_s28  ;;  %p677_p9 = pneg %p907_p4 }
  0x4b   : > { %s680_s9 = scalar_lea.hbm %s1098_s2, 1024  ;;  %p681_p5 = scmp.lt.u32.totalorder %s980_s19, %s1098_s2 }
  0x4c   : > { %p678_p0 = pnand %p677_p9, %p676_p8  ;;  %p682_p1 = scmp.lt.u32.totalorder %s680_s9, %s675_s28 }
  0x4d   : > { %p684_p11 = scmp.lt.u32.totalorder %s675_s28, %s980_s19 }
  0x4e   : > { %p679_p13 = pneg %p678_p0  ;;  %p683_p6 = por %p682_p1, %p681_p5 }
  0x50   : > { %p685_p3 = por %p684_p11, %p683_p6 }
  0x52   : > { %p686_p7 = pnand %p685_p3, %p679_p13 }
  0x54   : > { %689 = shalt.err (!%p686_p7)
}
  0x55   : > { %s690_s20 = scalar_lea.vmem %s984_s29, 512  ;;  %s801_s7 = smov [#allocation7]  }
  0x56   : > { %p691_p10 = scmp.ne.s32.totalorder %s984_s29, %s690_s20  ;;  %s695_s27 = sshll.u32 %s801_s7, 4  ;;  %s696_s27 = int_to_ptr.vmem [resolvable:$false] %s695_s27 }
  0x57   : > { %s697_s8 = scalar_lea.vmem %s696_s27, 1024  ;;  %p698_p0 = scmp.lt.s32.totalorder %s984_s29, %s696_s27 }
  0x58   : > { %p693_p2 = pnand %p691_p10, %p677_p9  ;;  %p699_p5 = scmp.lt.s32.totalorder %s697_s8, %s690_s20 }
  0x5a   : > { %p694_p8 = pneg %p693_p2  ;;  %p700_p1 = por %p699_p5, %p698_p0 }
  0x5c   : > { %p701_p6 = pnand %p700_p1, %p694_p8 }
  0x5e   : > { %704 = shalt.err (!%p701_p6)
}
  0x5f   : > { %s802_s28 = smov 256   ;;  %s1111_s10 = smov 128  }
  0x60   : > { %544 = dma.hbm_to_vmem [thread:$0]  (!%p907_p4), %s980_s19, 512, %s984_s29, %s991_s21, %s802_s28, %s1111_s10, %s800_s26  }
  0x61   : > { %208 = sbr.rel (%p889_p12) target bundleno = 379 (0x17b), region = 32  ;;  %p1112_p9 = scmp.eq.s32.totalorder (!%p889_p12), %s858_s18, 0 }
  0x68   : > { %758 = dma.done.wait (%p1112_p9), [#allocation3], 256   ;;  %p1113_p13 = pmov %p1112_p9 }
  0x69   : > { %p1114_p11 = pmov %p1112_p9 }
  0x6a   : > { %760 = vsyncadd (%p1113_p13), [#allocation3], 4294967040 }
  0x6b   : > { %762 = dma.done.wait (%p1114_p11), [#allocation6], 256   ;;  %p1115_p3 = pmov %p1112_p9 }
  0x6c   : > { %s218_s4 = sand.u32 1, %s858_s18   ;;  %s1033_s21 = sand.u32 1, %s779_s13  }
  0x6d   : > { %764 = vsyncadd (%p1115_p3), [#allocation6], 4294967040  ;;  %s487_s25 = sshll.u32 %s1033_s21, 5  ;;  %s219_s26 = scalar_lea.sflag [#allocation3], %s218_s4 }
  0x6e   : > { %s222_s19 = scalar_lea.vmem [#allocation7], %s487_s25  ;;  %p1116_p12 = scmp.ne.s32.totalorder %s1105_s22, 0 }
  0x70   : > { %766 = dma.done.wait (%p1116_p12), %s219_s26, 512  }
  0x71   : > { %768 = vsyncadd (%p1116_p12), %s219_s26, 4294966784  ;;  %v254_v0 = vld [vmem:[%s222_s19] sm:$0xff]  ;;  %v255_v1 = vld [vmem:[%s222_s19 + $0x8] sm:$0xff]  ;;  %vm258_vm0 = vcmask 261120   ;;  %s488_s18 = sshll.u32 %s1033_s21, 4  ;;  %s494_s22 = sshll.u32 %s787_s15, 7 }
  0x72   : > { %v256_v2 = vld [vmem:[%s222_s19 + $0x10] sm:$0xff]  ;;  %v514_v3 = vpack.c.bf16 %v255_v1, %v254_v0  ;;  %v257_v4 = vld [vmem:[%s222_s19 + $0x18] sm:$0xff]  ;;  %v248_v5 = vld [vmem:[#allocation2] sm:$0xff]  ;;  %s244_s29 = scalar_lea.vmem [#allocation8], %s488_s18  ;;  %s1045_s20 = scalar_lea.hbm %s1099_s3, %s494_s22 }
  0x73   : > { %v250_v6 = vld [vmem:[#allocation5] sm:$0xff]  ;;  %v518_v7 = vpack.c.bf16 %v257_v4, %v256_v2  ;;  %v249_v9 = vld [vmem:[#allocation2 + $0x8] sm:$0xff]  ;;  %v251_v10 = vld [vmem:[#allocation5 + $0x8] sm:$0xff]  ;;  %s370_s9 = sshll.u32 %s244_s29, 4  ;;  %s355_s7 = scalar_lea.sflag [#allocation4], %s1033_s21  ;;  %s1047_s9 = int_to_ptr.vmem [resolvable:$true] %s370_s9 }
  0x74   : > { %v252_v8 = vmul.f32 %v250_v6, %v248_v5  ;;  %515 = vmatprep.subr.bf16.mxu0 %v514_v3  ;;  %v253_v11 = vmul.f32 %v251_v10, %v249_v9  ;;  %s705_s27 = scalar_lea.vmem %s1047_s9, 256  ;;  %p1117_p7 = scmp.ne.s32.totalorder %s1106_s23, 0 }
  0x75   : > { %517 = vmatpush3.bf16.msra.mxu0 %v514_v3  ;;  %p706_p4 = scmp.ne.s32.totalorder %s1047_s9, %s705_s27  ;;  %s803_s15 = smov [#allocation8]  }
  0x76   : > { %511 = vmatprep.mubr.msk.f32.mxu0 %vm258_vm0, %v252_v8  ;;  %519 = vmatprep.subr.bf16.mxu0 %v518_v7  ;;  %s709_s8 = sshll.u32 %s803_s15, 4  ;;  %s710_s8 = int_to_ptr.vmem [resolvable:$false] %s709_s8 }
  0x77   : > { %p707_p10 = pnand %p706_p4, %p1117_p7  ;;  %s711_s28 = scalar_lea.vmem %s710_s8, 512 }
  0x78   : > { %p712_p8 = scmp.lt.s32.totalorder %s1047_s9, %s710_s8  ;;  %p713_p0 = scmp.lt.s32.totalorder %s711_s28, %s705_s27 }
  0x79   : > { %521 = vmatpush3.bf16.msra.mxu0 %v518_v7  ;;  %p708_p2 = pneg %p707_p10 }
  0x7a   : > { %p714_p5 = por %p713_p0, %p712_p8 }
  0x7c   : > { %512 = vmatmul.mubr.msk.f32.vlgmr.msra.gmra.mrb[0].mxu0 %vm258_vm0, %v253_v11  ;;  %p715_p1 = pnand %p714_p5, %p708_p2 }
 0x14f   : > { %v513_v12 = vpop.f32.mrb[0].mxu0 }
 0x150   : > { %v492_v13 = vmul.f32 -1.442695, %v513_v12  ;;  %v331_v14 = vpop.f32.mrb[1].mxu0 }
 0x151   : > { %v491_v15 = vmul.f32 -1.442695, %v331_v14 }
 0x152   : > { %611 = vpow2.f32 %v492_v13 }
 0x153   : > { %613 = vpow2.f32 %v491_v15 }
 0x15c   : > { %v612_v16 = vpop.eup %611 }
 0x15d   : > { %v614_v17 = vpop.eup %613  ;;  %v347_v18 = vadd.f32 1.0, %v612_v16 }
 0x15e   : > { %v346_v19 = vadd.f32 1.0, %v614_v17 }
 0x15f   : > { %615 = vrcp.f32 %v347_v18 }
 0x160   : > { %617 = vrcp.f32 %v346_v19 }
 0x169   : > { %v616_v20 = vpop.eup %615 }
 0x16a   : > { %v618_v21 = vpop.eup %617  ;;  %353 = vst [vmem:[%s244_s29 + $0x8] sm:$0xff] %v616_v20 }
 0x16b   : > { %352 = vst [vmem:[%s244_s29] sm:$0xff] %v618_v21 }
 0x16c   : > { %718 = shalt.err (!%p715_p1)
}
 0x16d   : > { %s719_s10 = scalar_lea.hbm %s1045_s20, 256  ;;  %s723_s26 = scalar_lea.hbm %s1099_s3, 512 }
 0x16e   : > { %p720_p6 = scmp.ne.s32.totalorder %s1045_s20, %s719_s10  ;;  %p724_p11 = scmp.lt.u32.totalorder %s1045_s20, %s1099_s3 }
 0x16f   : > { %p725_p3 = scmp.lt.u32.totalorder %s723_s26, %s719_s10  ;;  %p727_p4 = scmp.lt.u32.totalorder %s719_s10, %s1045_s20 }
 0x170   : > { %p721_p9 = pnand %p720_p6, %p1117_p7 }
 0x171   : > { %p726_p12 = por %p725_p3, %p724_p11 }
 0x172   : > { %p722_p13 = pneg %p721_p9 }
 0x173   : > { %p728_p10 = por %p727_p4, %p726_p12 }
 0x175   : > { %p729_p2 = pnand %p728_p10, %p722_p13 }
 0x177   : > { %732 = shalt.err (!%p729_p2)
}
 0x178   : > { %s804_s22 = smov 128   ;;  %s805_s29 = smov 256  }
 0x179   : > { %s806_s11 = smov 8  }
 0x17a   : > { %532 = dma.vmem_to_hbm [thread:$0]  (%p1117_p7), %s1047_s9, 256, %s1045_s20, %s355_s7, %s804_s22, %s805_s29, %s806_s11  }
 0x17b PF: > { %s385_s30 = sand.u32 1, %s775_s12   ;;  %p1118_p8 = scmp.ne.s32.totalorder %s1107_s24, 0 }
 0x17c   : > { %p1119_p0 = scmp.ge.s32.totalorder %s795_s17, 2  ;;  %s386_s27 = scalar_lea.sflag [#allocation4], %s385_s30 }
 0x17e   : > { %p546_p5 = pnand %p1119_p0, %p1118_p8 }
 0x180   : > { %770 = dma.done.wait (!%p546_p5), %s386_s27, 256  }
 0x181   : > { %772 = vsyncadd (!%p546_p5), %s386_s27, 4294967040  ;;  %s18_s17 = sadd.s32 1, %s795_s17   ;;  %s1120_s12 = smov %s779_s13 }
 0x182   : > { %p15_p1 = scmp.ge.s32.totalorder %s18_s17, 4   ;;  %s1121_s13 = smov %s783_s14 }
 0x183   : > { %s1122_s14 = smov %s989_s5  ;;  %s1123_s15 = smov %s791_s16 }
 0x184   : > { %s1124_s16 = smov %s1126_s6  ;;  %17 = sbr.rel (!%p15_p1) target bundleno = 6 (0x6), region = 86 }
 0x18b   :  { %391 = vsyncpa [#allocation3], 1 }
 0x18c   :  { %393 = vsyncpa [#allocation3 + $0x1], 1 }
 0x18d   :  { %394 = vsyncpa [#allocation6], 1 }
 0x18e   :  { %395 = vsyncpa [#allocation4], 1 }
 0x18f   :  { %397 = vsyncpa [#allocation4 + $0x1], 1 }

</bundles_post_ra>
